<compile_context>
chip_gen: v6e
topology: v6e:2x2x1
jax: 0.10.0
libtpu: 0.0.40
codegen_flags: <defaults>
</compile_context>

<pallas_src>
import jax
import jax.numpy as jnp
from jax.experimental import pallas as pl
from jax.experimental.pallas import tpu as pltpu


def _folded_kernel(r_ref, s_ref, w_ref, b_ref, o_ref):
    # r_ref: (TM, G)  s_ref: (G, L) 0/1 selection  w_ref/b_ref: (1, L)  o_ref: (TM, L)
    # Lane expansion on the idle MXU. HIGHEST precision => r is reconstructed
    # exactly, so the subsequent VPU fma matches f32 nn.Linear bit-for-bit.
    r_exp = jnp.dot(
        r_ref[...], s_ref[...],
        preferred_element_type=jnp.float32,
        precision=jax.lax.Precision.HIGHEST,
    )
    o_ref[...] = (r_exp * w_ref[...] + b_ref[...]).astype(o_ref.dtype)


def _plain_kernel(r_ref, w_ref, b_ref, o_ref):
    # r_ref: (TM, 1)  w_ref/b_ref: (1, E)  o_ref: (TM, E) — VPU broadcast fma.
    o_ref[...] = (r_ref[...] * w_ref[...] + b_ref[...]).astype(o_ref.dtype)


def return_embedding(returns, weight, bias, *, out_dtype=jnp.float32,
                     stream_budget_bytes=28 * 1024 * 1024,
                     vmem_limit_bytes=40 * 1024 * 1024):
    """Pallas equivalent of nn.Linear(1, E) applied to `returns`.

    returns: (..., 1) float
    weight:  (E, 1)  float   (PyTorch layout: out_features x in_features)
    bias:    (E,)    float
    out_dtype: output dtype (float32 matches nn.Linear; bf16 is opt-in and
               halves the HBM writeback on this writeback-bound op).
    """
    assert returns.shape[-1] == 1, "ReturnEmbedding expects last dim == 1"
    E = weight.shape[0]
    lead = returns.shape[:-1]
    n = 1
    for d in lead:
        n *= d

    r_flat = returns.reshape(n).astype(jnp.float32)
    # PyTorch weight is (E, 1); flattening to (1, E) avoids an XLA transpose.
    w_row = weight.reshape(1, E).astype(jnp.float32)
    b_row = bias.reshape(1, E).astype(jnp.float32)

    # Lane-dense folding: pack G = 128 // E consecutive output rows into the
    # 128-lane axis whenever E divides 128 (no masked stores, any E >= 1).
    groups = (128 // E) if (E < 128 and 128 % E == 0) else 1
    L = groups * E

    # Pad the row count up to a multiple of G (sliced off after the kernel).
    M = -(-n // groups)
    n_pad = M * groups
    if n_pad != n:
        r_flat = jnp.pad(r_flat, (0, n_pad - n))
    r2d = r_flat.reshape(M, groups)

    sel = None
    if groups > 1:
        # w_tiled[g*E + e] = w[e]; same for bias.
        w_row = jnp.tile(w_row, (1, groups))
        b_row = jnp.tile(b_row, (1, groups))
        # 0/1 selection matrix: S[g, g*E + e] = 1.
        sel = jnp.repeat(jnp.eye(groups, dtype=jnp.float32), E, axis=1)  # (G, L)

    # Row-tile sizing. Account for the 128-lane VMEM padding of the narrow
    # (tm, G) returns block and double-buffering of both streamed operands
    # (the resident weight/bias/selection blocks are tiny).
    lane_pad = lambda c: ((c + 127) // 128) * 128
    in_row_bytes = lane_pad(groups) * 4
    out_row_bytes = lane_pad(L) * jnp.dtype(out_dtype).itemsize
    per_row = 2 * in_row_bytes + 2 * out_row_bytes
    tm = stream_budget_bytes // per_row
    tm = max(8, (tm // 8) * 8)
    if tm > M:
        tm = M
    grid = (pl.cdiv(M, tm),)

    cparams = pltpu.CompilerParams(
        dimension_semantics=("parallel",),
        vmem_limit_bytes=vmem_limit_bytes,
    )
    out_shape = jax.ShapeDtypeStruct((M, L), out_dtype)

    if groups > 1:
        out = pl.pallas_call(
            _folded_kernel,
            out_shape=out_shape,
            grid=grid,
            in_specs=[
                pl.BlockSpec((tm, groups), lambda i: (i, 0)),   # returns rows
                pl.BlockSpec((groups, L), lambda i: (0, 0)),     # selection (resident)
                pl.BlockSpec((1, L), lambda i: (0, 0)),          # weight (resident)
                pl.BlockSpec((1, L), lambda i: (0, 0)),          # bias   (resident)
            ],
            out_specs=pl.BlockSpec((tm, L), lambda i: (i, 0)),
            compiler_params=cparams,
        )(r2d, sel, w_row, b_row)
    else:
        out = pl.pallas_call(
            _plain_kernel,
            out_shape=out_shape,
            grid=grid,
            in_specs=[
                pl.BlockSpec((tm, 1), lambda i: (i, 0)),         # returns rows
                pl.BlockSpec((1, E), lambda i: (0, 0)),          # weight (resident)
                pl.BlockSpec((1, E), lambda i: (0, 0)),          # bias   (resident)
            ],
            out_specs=pl.BlockSpec((tm, E), lambda i: (i, 0)),
            compiler_params=cparams,
        )(r2d, w_row, b_row)

    # (M, L) row-major is the same contiguous bytes as (n_pad, E) since L = G*E.
    out = out.reshape(n_pad, E)
    if n_pad != n:
        out = out[:n]
    return out.reshape(*lead, E)


def init_params(key, plm_embed_size):
    """Deterministic init matching nn.Linear(1, E) default:
    U(-1/sqrt(in_features), 1/sqrt(in_features)) = U(-1, 1)."""
    kw, kb = jax.random.split(key)
    bound = 1.0  # 1 / sqrt(in_features=1)
    weight = jax.random.uniform(kw, (plm_embed_size, 1), jnp.float32,
                                minval=-bound, maxval=bound)
    bias = jax.random.uniform(kb, (plm_embed_size,), jnp.float32,
                              minval=-bound, maxval=bound)
    return weight, bias


if __name__ == "__main__":
    key = jax.random.PRNGKey(0)
    k_in1, k_in2, k_p1, k_p2, k_p3 = jax.random.split(key, 5)

    def reference(r, w, b):
        return r @ w.T + b

    batch, seq = 2, 8
    returns = jax.random.normal(k_in1, (batch, seq, 1), jnp.float32)

    # Path 1: small embed (E=32 < 128) -> lane-folded, MXU-expansion path (G=4).
    E1 = 32
    w1, b1 = init_params(k_p1, E1)
    out1 = jax.block_until_ready(return_embedding(returns, w1, b1))
    assert out1.shape == (batch, seq, E1)
    assert jnp.allclose(out1, reference(returns, w1, b1), atol=1e-5, rtol=1e-5)

    # Path 2: embed multiple of 128 -> plain row-tiled broadcast path.
    E2 = 256
    w2, b2 = init_params(k_p2, E2)
    out2 = jax.block_until_ready(return_embedding(returns, w2, b2))
    assert out2.shape == (batch, seq, E2)
    assert jnp.allclose(out2, reference(returns, w2, b2), atol=1e-5, rtol=1e-5)

    # Path 3: tiny embed (E=8 -> G=16) with row count not divisible by G
    # (n=15) -> exercises the row-padding + slice path.
    E3 = 8
    returns3 = jax.random.normal(k_in2, (3, 5, 1), jnp.float32)
    w3, b3 = init_params(k_p3, E3)
    out3 = jax.block_until_ready(return_embedding(returns3, w3, b3))
    assert out3.shape == (3, 5, E3)
    assert jnp.allclose(out3, reference(returns3, w3, b3), atol=1e-5, rtol=1e-5)

    print("KERNEL_OK")
</pallas_src>

<mosaic_0001>
module attributes {stable_mosaic.version = 11 : i64} {
  func.func @_folded_kernel(%arg0: i32, %arg1: memref<4x4xf32, #tpu.memory_space<vmem>>, %arg2: memref<4x128xf32, #tpu.memory_space<vmem>>, %arg3: memref<1x128xf32, #tpu.memory_space<vmem>>, %arg4: memref<1x128xf32, #tpu.memory_space<vmem>>, %arg5: memref<4x128xf32, #tpu.memory_space<vmem>>) attributes {dimension_semantics = [#tpu.dimension_semantics<parallel>], iteration_bounds = array<i64: 1>, scalar_prefetch = 0 : i64, scratch_operands = 0 : i64, tpu.core_type = #tpu.core_type<tc>, window_params = [{transform_indices = @transform_0, window_bounds = array<i64: 4, 4>}, {pipeline_mode = #tpu.pipeline_mode<synchronous>, transform_indices = @transform_1, window_bounds = array<i64: 4, 128>}, {pipeline_mode = #tpu.pipeline_mode<synchronous>, transform_indices = @transform_2, window_bounds = array<i64: 1, 128>}, {pipeline_mode = #tpu.pipeline_mode<synchronous>, transform_indices = @transform_3, window_bounds = array<i64: 1, 128>}, {transform_indices = @transform_4, window_bounds = array<i64: 4, 128>}]} {
    %c0 = arith.constant 0 : index
    %c0_0 = arith.constant 0 : index
    %0 = vector.load %arg1[%c0, %c0_0] : memref<4x4xf32, #tpu.memory_space<vmem>>, vector<4x4xf32>
    %c0_1 = arith.constant 0 : index
    %c0_2 = arith.constant 0 : index
    %1 = vector.load %arg2[%c0_1, %c0_2] : memref<4x128xf32, #tpu.memory_space<vmem>>, vector<4x128xf32>
    %cst = arith.constant dense<0.000000e+00> : vector<4x128xf32>
    %2 = tpu.matmul %0, %1, %cst {dimension_numbers = #tpu.dot_dimension_numbers<[1], [0], [0], [1], [0, 0, 1, 1], [], []>, precision = #tpu.contract_precision<fp32>} : vector<4x4xf32>, vector<4x128xf32>, vector<4x128xf32> -> vector<4x128xf32>
    %c0_3 = arith.constant 0 : index
    %c0_4 = arith.constant 0 : index
    %3 = vector.load %arg3[%c0_3, %c0_4] : memref<1x128xf32, #tpu.memory_space<vmem>>, vector<1x128xf32>
    %4 = vector.broadcast %3 : vector<1x128xf32> to vector<4x128xf32>
    %5 = arith.mulf %2, %4 : vector<4x128xf32>
    %c0_5 = arith.constant 0 : index
    %c0_6 = arith.constant 0 : index
    %6 = vector.load %arg4[%c0_5, %c0_6] : memref<1x128xf32, #tpu.memory_space<vmem>>, vector<1x128xf32>
    %7 = vector.broadcast %6 : vector<1x128xf32> to vector<4x128xf32>
    %8 = arith.addf %5, %7 : vector<4x128xf32>
    %c0_7 = arith.constant 0 : index
    %c0_8 = arith.constant 0 : index
    %9 = vector.load %arg5[%c0_7, %c0_8] : memref<4x128xf32, #tpu.memory_space<vmem>>, vector<4x128xf32>
    tpu.vector_store %arg5[%c0_7, %c0_8], %8 {strides = array<i32>} : memref<4x128xf32, #tpu.memory_space<vmem>>, vector<4x128xf32>,
    return
  }
  func.func @transform_0(%arg0: i32) -> (i32, i32) {
    %c0_i32 = arith.constant 0 : i32
    %c0_i32_0 = arith.constant 0 : i32
    return %arg0, %c0_i32 : i32, i32
  }
  func.func @transform_1(%arg0: i32) -> (i32, i32) {
    %c0_i32 = arith.constant 0 : i32
    %c0_i32_0 = arith.constant 0 : i32
    %c0_i32_1 = arith.constant 0 : i32
    return %c0_i32, %c0_i32_0 : i32, i32
  }
  func.func @transform_2(%arg0: i32) -> (i32, i32) {
    %c0_i32 = arith.constant 0 : i32
    %c0_i32_0 = arith.constant 0 : i32
    %c0_i32_1 = arith.constant 0 : i32
    return %c0_i32, %c0_i32_0 : i32, i32
  }
  func.func @transform_3(%arg0: i32) -> (i32, i32) {
    %c0_i32 = arith.constant 0 : i32
    %c0_i32_0 = arith.constant 0 : i32
    %c0_i32_1 = arith.constant 0 : i32
    return %c0_i32, %c0_i32_0 : i32, i32
  }
  func.func @transform_4(%arg0: i32) -> (i32, i32) {
    %c0_i32 = arith.constant 0 : i32
    %c0_i32_0 = arith.constant 0 : i32
    return %arg0, %c0_i32 : i32, i32
  }
}

</mosaic_0001>

<bundles_post_ra>
// kernel: tpu_custom_call.1
= control target key start
LH: loop header
LB: loop body
LE: loop exit
PB: predicated region body
PF: predicated region fallthrough
CT: control target
= control target key end

     0   :  { %9 = vsyncpa [#allocation3], 0  ;;  %s697_s0 = inlined_call_operand.hbm [shape: f32[4,4], index: 0, kind: input, shape index: {}]   ;;  %s698_s1 = inlined_call_operand.hbm [shape: f32[4,128], index: 1, kind: input, shape index: {}]   ;;  %s699_s2 = inlined_call_operand.vmem [shape: f32[1,128], index: 2, kind: input, shape index: {}]   ;;  %s700_s3 = inlined_call_operand.vmem [shape: f32[1,128], index: 3, kind: input, shape index: {}]   ;;  %s701_s4 = inlined_call_operand.hbm [shape: f32[4,128], index: 4, kind: output, shape index: {}]  }
   0x1   :  { %10 = vsyncpa [#allocation6], 0 }
   0x2   :  { %11 = vsyncpa [#allocation4], 0  ;;  %s646_s15 = smov [#allocation2]   ;;  %s647_s17 = smov [#allocation5]  }
   0x3   :  { %s18_s16 = sshll.u32 %s646_s15, 4  ;;  %s28_s18 = sshll.u32 %s647_s17, 4  ;;  %s19_s16 = int_to_ptr.vmem [resolvable:$true] %s18_s16  ;;  %s29_s18 = int_to_ptr.vmem [resolvable:$true] %s28_s18 }
   0x4   :  { %s588_s19 = scalar_lea.vmem %s19_s16, 64  ;;  %p593_p1 = scmp.lt.s32.totalorder %s19_s16, %s19_s16 }
   0x5   :  { %p589_p0 = scmp.ne.s32.totalorder %s19_s16, %s588_s19  ;;  %p594_p2 = scmp.lt.s32.totalorder %s588_s19, %s588_s19 }
   0x7   :  { %p595_p3 = por %p594_p2, %p593_p1 }
   0x9   :  { %p596_p4 = pnand %p595_p3, %p589_p0 }
   0xb   :  { %599 = shalt.err (!%p596_p4)
}
   0xc   :  { %21 = dma.hbm_to_vmem [thread:$0]  %s697_s0, 64, %s19_s16, [#allocation3]  }
   0xd   :  { %s608_s22 = scalar_lea.vmem %s29_s18, 64  ;;  %p613_p6 = scmp.lt.s32.totalorder %s29_s18, %s29_s18 }
   0xe   :  { %p609_p5 = scmp.ne.s32.totalorder %s29_s18, %s608_s22  ;;  %p614_p7 = scmp.lt.s32.totalorder %s608_s22, %s608_s22 }
  0x10   :  { %p615_p8 = por %p614_p7, %p613_p6 }
  0x12   :  { %p616_p9 = pnand %p615_p8, %p609_p5 }
  0x14   :  { %619 = shalt.err (!%p616_p9)
}
  0x15   :  { %31 = dma.hbm_to_vmem [thread:$0]  %s698_s1, 64, %s29_s18, [#allocation6]  }
  0x16   :  { %640 = dma.done.wait [#allocation3], 64  }
  0x17   :  { %641 = vsyncadd [#allocation3], 4294967232 }
  0x18   :  { %642 = dma.done.wait [#allocation6], 64  }
  0x19   :  { %643 = vsyncadd [#allocation6], 4294967232  ;;  %v648_v0 = vmov 0.0   ;;  %vm649_vm0 = vmmov 0   ;;  %vm48_vm1 = vcmask 1043456   ;;  %vm44_vm2 = vcmask 31744  }
  0x1a   :  { %545 = vmatprep.subr.mxu0 %v648_v0  ;;  %547 = vmatprep.mubr.msk.f32.mxu0 %vm649_vm0, %v648_v0  ;;  %v43_v1 = vld [vmem:[#allocation5] sm:$0xf]  ;;  %v42_v2 = vld [vmem:[#allocation2] sm:$0xf]  ;;  %s650_s27 = smov [#allocation7]  }
  0x1b   :  { %550 = vmatprep.subr.mxu1 %v648_v0  ;;  %552 = vmatprep.mubr.msk.f32.mxu1 %vm649_vm0, %v648_v0  ;;  %v50_v3 = vsel %vm48_vm1, %v43_v1, 0  ;;  %v46_v4 = vsel %vm44_vm2, %v42_v2, 0  ;;  %v531_v29 = vld [vmem:[%s699_s2] ss:$0 sm:$0xff]  ;;  %s521_s28 = sshll.u32 %s650_s27, 4  ;;  %s522_s28 = int_to_ptr.vmem [resolvable:$true] %s521_s28 }
  0x1c   :  { %v83_v5 = vand.u32 4294901760, %v50_v3  ;;  %v118_v6 = vand.u32 4294901760, %v46_v4  ;;  %v532_v33 = vld [vmem:[%s700_s3] ss:$0 sm:$0xff]  ;;  %s620_s29 = scalar_lea.vmem %s522_s28, 64  ;;  %p625_p11 = scmp.lt.s32.totalorder %s522_s28, %s522_s28 }
  0x1d   :  { %p621_p10 = scmp.ne.s32.totalorder %s522_s28, %s620_s29  ;;  %p626_p12 = scmp.lt.s32.totalorder %s620_s29, %s620_s29 }
  0x1e   :  { %546 = vmatpush3.msra.mxu0 %v83_v5  ;;  %v119_v7 = vsub.f32 %v46_v4, %v118_v6  ;;  %v160_v8 = vsub.f32 %v50_v3, %v83_v5 }
  0x1f   :  { %555 = vmatprep.subr.mxu0 %v648_v0  ;;  %p627_p13 = por %p626_p12, %p625_p11 }
  0x20   :  { %v120_v9 = vand.u32 4294901760, %v119_v7  ;;  %v161_v10 = vand.u32 4294901760, %v160_v8 }
  0x21   :  { %p628_p0 = pnand %p627_p13, %p621_p10 }
  0x22   :  { %v121_v11 = vsub.f32 %v119_v7, %v120_v9  ;;  %v162_v12 = vsub.f32 %v160_v8, %v161_v10 }
  0x24   :  { %v122_v13 = vand.u32 4294901760, %v121_v11  ;;  %v163_v14 = vand.u32 4294901760, %v162_v12 }
  0x26   :  { %548 = vmatmul.mubr.f32.vlgmr.msra.gmra.mxu0 %v122_v13  ;;  %551 = vmatpush3.msra.mxu1 %v163_v14 }
  0x27   :  { %556 = vmatpush3.msra.mxu0 %v160_v8  ;;  %553 = vmatmul.mubr.f32.vlgmr.msra.gmra.mxu1 %v118_v6 }
  0x28   :  { %560 = vmatprep.subr.mxu1 %v648_v0  ;;  %557 = vmatprep.mubr.msk.f32.mxu0 %vm649_vm0, %v648_v0 }
  0x29   :  { %561 = vmatpush3.msra.mxu1 %v83_v5  ;;  %565 = vmatprep.subr.mxu0 %v648_v0 }
  0x2a   :  { %558 = vmatmul.mubr.f32.vlgmr.msra.gmra.mxu0 %v119_v7  ;;  %562 = vmatprep.mubr.msk.f32.mxu1 %vm649_vm0, %v648_v0 }
  0x2b   :  { %566 = vmatpush3.msra.mxu0 %v161_v10  ;;  %563 = vmatmul.mubr.f32.vlgmr.msra.gmra.mxu1 %v120_v9 }
  0x2c   :  { %570 = vmatprep.subr.mxu1 %v648_v0  ;;  %567 = vmatprep.mubr.msk.f32.mxu0 %vm649_vm0, %v648_v0 }
  0x2d   :  { %571 = vmatpush3.msra.mxu1 %v83_v5  ;;  %572 = vmatprep.mubr.msk.f32.mxu1 %vm649_vm0, %v648_v0 }
  0x2e   :  { %568 = vmatmul.mubr.f32.vlgmr.msra.gmra.mxu0 %v118_v6 }
  0x2f   :  { %573 = vmatmul.mubr.f32.vlgmr.msra.gmra.mxu1 %v118_v6 }
  0xe6   :  { %v124_v15 = vpop.f32.mrf.mxu0 }
  0xe7   :  { %v200_v16 = vpop.f32.mrf.mxu1 }
  0xe8   :  { %v201_v17 = vadd.f32 %v200_v16, %v124_v15  ;;  %v549_v18 = vpop.f32.mrf.mxu0 }
  0xe9   :  { %v554_v19 = vpop.f32.mrf.mxu1 }
  0xea   :  { %v274_v20 = vpop.f32.mrf.mxu0 }
  0xeb   :  { %v275_v21 = vadd.f32 %v274_v20, %v201_v17  ;;  %v348_v22 = vpop.f32.mrf.mxu1 }
  0xec   :  { %v559_v23 = vpop.f32.mrf.mxu0 }
  0xed   :  { %v349_v24 = vadd.f32 %v348_v22, %v275_v21  ;;  %v564_v25 = vpop.f32.mrf.mxu1 }
  0xee   :  { %v422_v26 = vpop.f32.mrf.mxu0 }
  0xef   :  { %v423_v27 = vadd.f32 %v422_v26, %v349_v24  ;;  %v494_v28 = vpop.f32.mrf.mxu1 }
  0xf0   :  { %v569_v30 = vpop.f32.mrf.mxu0 }
  0xf1   :  { %v495_v31 = vadd.f32 %v494_v28, %v423_v27  ;;  %v574_v32 = vpop.f32.mrf.mxu1 }
  0xf3   :  { %v505_v34 = vmul.f32 %v531_v29, %v495_v31 }
  0xf5   :  { %v513_v35 = vadd.f32 %v532_v33, %v505_v34 }
  0xf7   :  { %514 = vst [vmem:[#allocation7] sm:$0xf] %v513_v35 }
  0xf8   :  { %631 = shalt.err (!%p628_p0)
}
  0xf9   :  { %524 = dma.vmem_to_hbm [thread:$0]  %s522_s28, 64, %s701_s4, [#allocation4]  }
  0xfa   :  { %644 = dma.done.wait [#allocation4], 64  }
  0xfb   :  { %645 = vsyncadd [#allocation4], 4294967232 }
  0xfc   :  { %528 = vsyncpa [#allocation3], 1 }
  0xfd   :  { %529 = vsyncpa [#allocation6], 1 }
  0xfe   :  { %530 = vsyncpa [#allocation4], 1 }

</bundles_post_ra>
